<compile_context>
chip_gen: v5e
topology: v5e:2x2
jax: 0.10.0
libtpu: 0.0.40
codegen_flags: <defaults>
</compile_context>

<pallas_src>
import functools
import math

import jax
import jax.numpy as jnp
from jax.experimental import pallas as pl
from jax.experimental.pallas import tpu as pltpu


def layer1_kernel(x_ref, x1_ref, x2_ref, w_ref, out_ref, xz_ref,
                  *, k_in, n_out, mxu_bf16):
    # Assemble xz = [x | x1+x2 | 1.0] in a VMEM scratch with static-slice
    # writes (everything here is a handful of vregs); the recurrent add is a
    # plain VPU add, no in-kernel concat and no second dot.
    xz_ref[:, :k_in] = x_ref[...].astype(xz_ref.dtype)
    xz_ref[:, k_in:k_in + n_out] = (x1_ref[...] + x2_ref[...]).astype(xz_ref.dtype)
    xz_ref[:, k_in + n_out:] = jnp.ones((x_ref.shape[0], 1), xz_ref.dtype)

    xz = xz_ref[...]
    w = w_ref[...]
    if mxu_bf16:
        # v5e-oriented: MXU is bf16-native; keep f32 accumulation.
        xz = xz.astype(jnp.bfloat16)
        w = w.astype(jnp.bfloat16)

    # Single fused MXU matmul against W_aug = [W_in ; W_rec ; b_in]
    # (the bias rides along via the constant-1 column of xz).
    a = jnp.dot(xz, w, preferred_element_type=jnp.float32)
    # tanh on the EUP; output is a single small tile, stored directly.
    out_ref[...] = jnp.tanh(a).astype(out_ref.dtype)


def layer1_forward(x, x_layer1, x_layer2, w_in, w_rec, b_in, *, mxu_bf16=False):
    B, k_in = x.shape
    n_out = w_in.shape[1]

    # Only wrapper-side op: K-concatenate the weights + bias row -> one MXU
    # matmul in-kernel against a single VMEM-resident operand.
    w_aug = jnp.concatenate(
        [w_in, w_rec, b_in.reshape(1, n_out)], axis=0)      # [K_in + N + 1, N]

    vmem = pl.BlockSpec(memory_space=pltpu.MemorySpace.VMEM)
    kernel = functools.partial(
        layer1_kernel, k_in=k_in, n_out=n_out, mxu_bf16=mxu_bf16)

    # Gridless single-tile kernel: at these shapes everything (activations,
    # W_aug, output, xz scratch) is a few KiB, far below any VMEM limit.
    return pl.pallas_call(
        kernel,
        out_shape=jax.ShapeDtypeStruct((B, n_out), x.dtype),
        in_specs=[vmem, vmem, vmem, vmem],
        out_specs=vmem,
        scratch_shapes=[pltpu.VMEM((B, k_in + n_out + 1), jnp.float32)],
    )(x, x_layer1, x_layer2, w_aug)


# TODO(synk): if Layer1 is driven recurrently over T steps, fuse that loop into
# the kernel (grid=(T,), dimension_semantics=("arbitrary",)): W_aug's index_map
# returns the same block every step so the weights stay VMEM-resident, and the
# recurrent state lives in a VMEM scratch instead of bouncing through HBM
# between pallas_calls. The module forward above is a single step, so that
# fusion belongs at the caller.
# TODO(synk): on v7x (2 TensorCores) add a "parallel" grid axis over batch /
# output tiles once B or num_outputs grow enough to fill the MXU; at B=8,N=32
# it would only add per-step overhead.


def xavier_uniform(key, shape, dtype=jnp.float32):
    fan_in, fan_out = shape
    bound = math.sqrt(6.0 / (fan_in + fan_out))
    return jax.random.uniform(key, shape, dtype, minval=-bound, maxval=bound)


if __name__ == "__main__":
    num_inputs, num_outputs = 16, 32
    batch = 8

    key = jax.random.PRNGKey(0)
    k_win, k_wrec, k_x, k_x1, k_x2 = jax.random.split(key, 5)

    # Deterministic parameter init (matches module __init__ shapes).
    W_in = xavier_uniform(k_win, (num_inputs, num_outputs))
    b_in = jnp.zeros((num_outputs,), jnp.float32)
    W_rec = xavier_uniform(k_wrec, (num_outputs, num_outputs))

    x = jax.random.normal(k_x, (batch, num_inputs), jnp.float32)
    x_layer1 = jax.random.normal(k_x1, (batch, num_outputs), jnp.float32)
    x_layer2 = jax.random.normal(k_x2, (batch, num_outputs), jnp.float32)

    fwd = jax.jit(layer1_forward, static_argnames=("mxu_bf16",))
    z = fwd(x, x_layer1, x_layer2, W_in, W_rec, b_in)
    jax.block_until_ready(z)

    # Pure-JAX reference check.
    z_ref = jnp.tanh(x @ W_in + (x_layer1 + x_layer2) @ W_rec + b_in)
    assert z.shape == z_ref.shape
    assert jnp.allclose(z, z_ref, atol=1e-5, rtol=1e-5)

    print("KERNEL_OK")
</pallas_src>

<mosaic_0001>
module attributes {stable_mosaic.version = 11 : i64} {
  func.func @layer1_kernel(%arg0: memref<8x16xf32, #tpu.memory_space<vmem>>, %arg1: memref<8x32xf32, #tpu.memory_space<vmem>>, %arg2: memref<8x32xf32, #tpu.memory_space<vmem>>, %arg3: memref<49x32xf32, #tpu.memory_space<vmem>>, %arg4: memref<8x32xf32, #tpu.memory_space<vmem>>, %arg5: memref<8x49xf32, #tpu.memory_space<vmem>>) attributes {dimension_semantics = [], scalar_prefetch = 0 : i64, scratch_operands = 1 : i64, tpu.core_type = #tpu.core_type<tc>} {
    %c0 = arith.constant 0 : index
    %c0_0 = arith.constant 0 : index
    %0 = vector.load %arg0[%c0, %c0_0] : memref<8x16xf32, #tpu.memory_space<vmem>>, vector<8x16xf32>
    %c0_1 = arith.constant 0 : index
    %c0_2 = arith.constant 0 : index
    %1 = vector.load %arg5[%c0_1, %c0_2] : memref<8x49xf32, #tpu.memory_space<vmem>>, vector<8x16xf32>
    tpu.vector_store %arg5[%c0_1, %c0_2], %0 {strides = array<i32>} : memref<8x49xf32, #tpu.memory_space<vmem>>, vector<8x16xf32>,
    %c0_3 = arith.constant 0 : index
    %c0_4 = arith.constant 0 : index
    %2 = vector.load %arg1[%c0_3, %c0_4] : memref<8x32xf32, #tpu.memory_space<vmem>>, vector<8x32xf32>
    %c0_5 = arith.constant 0 : index
    %c0_6 = arith.constant 0 : index
    %3 = vector.load %arg2[%c0_5, %c0_6] : memref<8x32xf32, #tpu.memory_space<vmem>>, vector<8x32xf32>
    %4 = arith.addf %2, %3 : vector<8x32xf32>
    %c0_7 = arith.constant 0 : index
    %c16 = arith.constant 16 : index
    %5 = vector.load %arg5[%c0_7, %c16] : memref<8x49xf32, #tpu.memory_space<vmem>>, vector<8x32xf32>
    tpu.vector_store %arg5[%c0_7, %c16], %4 {strides = array<i32>} : memref<8x49xf32, #tpu.memory_space<vmem>>, vector<8x32xf32>,
    %cst = arith.constant 1.000000e+00 : f32
    %6 = vector.broadcast %cst : f32 to vector<8x1xf32>
    %c0_8 = arith.constant 0 : index
    %c48 = arith.constant 48 : index
    %7 = vector.load %arg5[%c0_8, %c48] : memref<8x49xf32, #tpu.memory_space<vmem>>, vector<8x1xf32>
    tpu.vector_store %arg5[%c0_8, %c48], %6 {strides = array<i32>} : memref<8x49xf32, #tpu.memory_space<vmem>>, vector<8x1xf32>,
    %c0_9 = arith.constant 0 : index
    %c0_10 = arith.constant 0 : index
    %8 = vector.load %arg5[%c0_9, %c0_10] : memref<8x49xf32, #tpu.memory_space<vmem>>, vector<8x49xf32>
    %c0_11 = arith.constant 0 : index
    %c0_12 = arith.constant 0 : index
    %9 = vector.load %arg3[%c0_11, %c0_12] : memref<49x32xf32, #tpu.memory_space<vmem>>, vector<49x32xf32>
    %cst_13 = arith.constant dense<0.000000e+00> : vector<8x32xf32>
    %10 = tpu.matmul %8, %9, %cst_13 {dimension_numbers = #tpu.dot_dimension_numbers<[1], [0], [0], [1], [0, 0, 1, 1], [], []>} : vector<8x49xf32>, vector<49x32xf32>, vector<8x32xf32> -> vector<8x32xf32>
    %11 = math.tanh %10 : vector<8x32xf32>
    %c0_14 = arith.constant 0 : index
    %c0_15 = arith.constant 0 : index
    %12 = vector.load %arg4[%c0_14, %c0_15] : memref<8x32xf32, #tpu.memory_space<vmem>>, vector<8x32xf32>
    tpu.vector_store %arg4[%c0_14, %c0_15], %11 {strides = array<i32>} : memref<8x32xf32, #tpu.memory_space<vmem>>, vector<8x32xf32>,
    return
  }
}

</mosaic_0001>

<bundles_post_ra>
// kernel: layer1_forward.1
= control target key start
LH: loop header
LB: loop body
LE: loop exit
PB: predicated region body
PF: predicated region fallthrough
CT: control target
= control target key end

     0   :  { %vm44_vm0 = vcmask 1040384   ;;  %vm19_vm1 = vcmask 130048   ;;  %s181_s0 = inlined_call_operand.vmem [shape: f32[8,16], index: 0, kind: input, shape index: {}]   ;;  %s182_s1 = inlined_call_operand.vmem [shape: f32[8,32], index: 1, kind: input, shape index: {}]   ;;  %s183_s2 = inlined_call_operand.vmem [shape: f32[8,32], index: 2, kind: input, shape index: {}]   ;;  %s184_s3 = inlined_call_operand.vmem [shape: f32[49,32], index: 3, kind: input, shape index: {}]   ;;  %s185_s4 = inlined_call_operand.hbm [shape: f32[8,32], index: 4, kind: output, shape index: {}]  }
   0x1   :  { %v21_v0 = vld [vmem:[%s182_s1] sm:$0xff]  ;;  %v39_v2 = vld [vmem:[%s184_s3 + $0x30] sm:$0x1]  ;;  %v38_v4 = vld [vmem:[%s184_s3 + $0x28] sm:$0xff] }
   0x2   :  { %v22_v1 = vld [vmem:[%s183_s2] sm:$0xff]  ;;  %87 = vmatpush.msk.msra.mxu0 %vm44_vm0, %v39_v2 }
   0x3   :  { %v23_v3 = vadd.f32 %v22_v1, %v21_v0  ;;  %v18_v5 = vld [vmem:[%s181_s0] sm:$0xff] }
   0x4   :  { %9 = vsyncpa [#allocation4], 0  ;;  %20 = vst.msk [vmem:[#allocation2] sm:$0xff] %vm19_vm1, %v18_v5  ;;  %s120_s1 = smov 16   ;;  %58 = vmatpush.msra.mxu0 %v38_v4  ;;  %v37_v6 = vld [vmem:[%s184_s3 + $0x20] sm:$0xff]  ;;  %v36_v7 = vld [vmem:[%s184_s3 + $0x18] sm:$0xff] }
   0x5   :  { %25 = vrot.lane.b32.xlu0 %v23_v3, %s120_s1  ;;  %v35_v8 = vld [vmem:[%s184_s3 + $0x10] sm:$0xff]  ;;  %v34_v9 = vld [vmem:[%s184_s3 + $0x8] sm:$0xff]  ;;  %v33_v10 = vld [vmem:[%s184_s3] sm:$0xff]  ;;  %vm28_vm2 = vcmask 392320   ;;  %vm30_vm3 = vcmask 400768   ;;  %v121_v12 = vmov 1.0  }
   0x6   :  { %59 = vmatpush.msra.mxu0 %v37_v6  ;;  %vm40_vm4 = vcmask 400384   ;;  %s122_s7 = smov [#allocation3]   ;;  %s78_s11 = sshll.u32 %s185_s4, 4  ;;  %vm69_vm5 = vcmask 261120   ;;  %s79_s11 = int_to_ptr.hbm [resolvable:$true] %s78_s11 }
   0x7   :  { %s76_s8 = sshll.u32 %s122_s7, 4  ;;  %s77_s8 = int_to_ptr.vmem [resolvable:$true] %s76_s8 }
   0x8   :  { %60 = vmatpush.msra.mxu0 %v36_v7 }
   0xa   :  { %61 = vmatpush.msra.mxu0 %v35_v8 }
   0xc   :  { %62 = vmatpush.msra.mxu0 %v34_v9 }
   0xe   :  { %63 = vmatpush.msra.mxu0 %v33_v10 }
  0x77   :  { %v26_v11 = vpop.permute.xlu0 %25 }
  0x78   :  { %29 = vst.msk [vmem:[#allocation2] sm:$0xff] %vm28_vm2, %v26_v11 }
  0x79   :  { %31 = vst.msk [vmem:[#allocation2] sm:$0xff] %vm30_vm3, %v121_v12 }
  0x80   :  { %v32_v13 = vld [vmem:[#allocation2] sm:$0xff] }
  0x81   :  { %88 = vmatmul.msk.f32.vlgmr.msra.gmra.mxu0 %vm40_vm4, %v32_v13 }
  0xfe   :  { %v65_v14 = vpop.f32.mrf.mxu0 }
  0xff   :  { %92 = vtanh.f32 %v65_v14 }
 0x105   :  { %v93_v15 = vpop.eup %92 }
 0x106   :  { %70 = vst.msk [vmem:[#allocation3] sm:$0xff] %vm69_vm5, %v93_v15 }
 0x107   :  { %81 = dma.vmem_to_hbm [thread:$0]  %s77_s8, 128, %s79_s11, [#allocation4]  }
 0x108   :  { %118 = dma.done.wait [#allocation4], 128  }
 0x109   :  { %119 = vsyncadd [#allocation4], 4294967168 }
 0x10a   :  { %86 = vsyncpa [#allocation4], 1 }

</bundles_post_ra>
